<compile_context>
chip_gen: v5e
topology: v5e:2x2
jax: 0.10.0
libtpu: 0.0.40
codegen_flags: <defaults>
</compile_context>

<pallas_src>
import math

import jax
import jax.numpy as jnp
from jax.experimental import pallas as pl
from jax.experimental.pallas import tpu as pltpu


def make_pe_buffer(d_model: int, max_len: int = 1000) -> jnp.ndarray:
    """Deterministic sin/cos positional-encoding buffer, shape (1, max_len, d_model)."""
    position = jnp.arange(max_len, dtype=jnp.float32)[:, None]            # (max_len, 1)
    div_term = jnp.exp(
        jnp.arange(0, d_model, 2, dtype=jnp.float32) * (-math.log(10000.0) / d_model)
    )                                                                      # (d_model/2,)
    pe = jnp.zeros((max_len, d_model), dtype=jnp.float32)
    pe = pe.at[:, 0::2].set(jnp.sin(position * div_term))
    pe = pe.at[:, 1::2].set(jnp.cos(position * div_term))
    return pe[None, :, :]                                                  # (1, max_len, d_model)


def _pe_add_kernel(x_ref, pe_ref, o_ref):
    # x_ref:  (ts, tn) tile in VMEM      (lane-dense last axis)
    # pe_ref: (1,  tn) tile in VMEM      (constant seq index_map -> resident across seq steps)
    # out[s, n] = x[s, n] + pe[0, n]  -- implicit sublane broadcast, pure VPU add.
    o_ref[...] = x_ref[...] + pe_ref[...]


def _sublane_multiple(itemsize: int) -> int:
    # Native sublane packing per vreg: f32 -> 8 rows, bf16/f16 -> 16, int8/fp8 -> 32.
    return max(8, 32 // max(1, itemsize))


def _seq_axis_semantics():
    """CORE_PARALLEL only changes codegen on 2-TC chips (v7x); PARALLEL elsewhere."""
    try:
        kind = jax.devices()[0].device_kind.lower()
    except Exception:
        kind = ""
    if ("v7" in kind) or ("7x" in kind):
        try:
            return pltpu.CORE_PARALLEL
        except AttributeError:
            pass
    return pltpu.PARALLEL


def _choose_tiles(S: int, N: int, itemsize: int, block_rows, budget_bytes: int):
    """Pick (ts, tn) so the double-buffered pipeline footprint stays under budget.

    Footprint ~= 2 buffers x (x tile + out tile) x ts x tn x itemsize  (+ tiny pe tile).
    """
    sub = _sublane_multiple(itemsize)
    per_row_full = 4 * N * itemsize                    # bytes per seq row at tn == N
    if sub * per_row_full <= budget_bytes:
        # Full lane extent fits: tile over seq only (lane-dense, unmasked stores).
        tn = N
        ts = budget_bytes // per_row_full
    else:
        # Even one sublane stripe of full N blows the budget: tile lanes too.
        tn = budget_bytes // (4 * sub * itemsize)
        tn = max(128, (tn // 128) * 128)               # multiple of 128 -> unmasked vst
        if tn >= N:
            tn = N
        ts = budget_bytes // (4 * tn * itemsize)
    if block_rows is not None:
        ts = block_rows
    ts = max(sub, (ts // sub) * sub)                   # dtype-aware sublane alignment
    if ts >= S:
        ts = S                                         # full-extent block is always legal
    return ts, tn


def positional_encoding_forward(
    x: jnp.ndarray,
    pe_buf: jnp.ndarray,
    *,
    block_rows: int | None = None,
    min_pallas_bytes: int = 1024 * 1024,
    force_pallas: bool = False,
    alias_input: bool = False,
    vmem_budget_bytes: int = 8 * 1024 * 1024,
) -> jnp.ndarray:
    """x: (seq_len, batch, d_model); pe_buf: (1, max_len, d_model)."""
    S, B, D = x.shape
    # The module's broadcast (S,B,D) + (1,S,D) only works when S == B.
    assert S == B, "PositionalEncoding (as written) requires x.size(0) == x.size(1)"

    # Same slice the PyTorch module takes: pe[:, :x.size(0), :] -> drop leading 1.
    pe_slice = pe_buf[0, :S, :]                                            # (S, D)

    # Tiny / fusable inputs: a lone elementwise add is best left to XLA fusion.
    if (not force_pallas) and (x.size * x.dtype.itemsize < min_pallas_bytes):
        return x + pe_slice[None, :, :].astype(x.dtype)

    # Lane-dense layout: flatten (B, D) into the last axis.
    #   x2[s, b*D + d]  = x[s, b, d]
    #   pe2[0, b*D + d] = pe[0, b, d]   (valid because S == B)
    N = B * D
    itemsize = x.dtype.itemsize
    x2 = x.reshape(S, N)
    pe2 = pe_slice.reshape(1, N).astype(x.dtype)       # match x dtype (no mixed-dtype store)

    ts, tn = _choose_tiles(S, N, itemsize, block_rows, vmem_budget_bytes)
    grid = (pl.cdiv(S, ts), pl.cdiv(N, tn))

    extra_kwargs = {}
    if alias_input:
        # x is consumed as "x += pe": alias it to the output to skip a second
        # full-size HBM allocation when the caller no longer needs x.
        extra_kwargs["input_output_aliases"] = {0: 0}

    out2 = pl.pallas_call(
        _pe_add_kernel,
        out_shape=jax.ShapeDtypeStruct((S, N), x.dtype),
        grid=grid,
        in_specs=[
            pl.BlockSpec((ts, tn), lambda i, j: (i, j)),   # x: tiled over seq (and lanes)
            pl.BlockSpec((1, tn), lambda i, j: (0, j)),    # pe: resident across seq steps
        ],
        out_specs=pl.BlockSpec((ts, tn), lambda i, j: (i, j)),
        compiler_params=pltpu.CompilerParams(
            # Seq tiles are independent; CORE_PARALLEL on v7x shards them across
            # both TensorCores, PARALLEL elsewhere (no-op on single-TC chips).
            dimension_semantics=(_seq_axis_semantics(), pltpu.ARBITRARY),
        ),
        cost_estimate=pl.CostEstimate(
            flops=S * N,
            transcendentals=0,
            bytes_accessed=2 * S * N * itemsize + N * itemsize,
        ),
        **extra_kwargs,
    )(x2, pe2)

    return out2.reshape(S, B, D)


if __name__ == "__main__":
    MAX_LEN = 1000
    key0, key1, key2 = jax.random.split(jax.random.PRNGKey(0), 3)

    # 1) Small canonical shapes consistent with the module (S == B required).
    S, B, D = 8, 8, 32
    pe_buf = make_pe_buffer(D, MAX_LEN)                    # (1, max_len, d_model)
    x = jax.random.normal(key0, (S, B, D), dtype=jnp.float32)

    out = positional_encoding_forward(x, pe_buf, force_pallas=True)
    out = jax.block_until_ready(out)

    # Reference: literal translation of `x + pe[:, :x.size(0), :]`.
    ref = x + pe_buf[:, :S, :]
    assert out.shape == ref.shape and out.dtype == ref.dtype
    assert jnp.allclose(out, ref, atol=1e-6, rtol=1e-6)

    # 2) Multi-tile, double-buffered seq pipeline (block_rows=32 -> 4 seq tiles).
    S2, B2, D2 = 128, 128, 32
    pe_buf2 = make_pe_buffer(D2, MAX_LEN)
    x2 = jax.random.normal(key1, (S2, B2, D2), dtype=jnp.float32)

    out2 = positional_encoding_forward(x2, pe_buf2, block_rows=32, force_pallas=True)
    out2 = jax.block_until_ready(out2)

    ref2 = x2 + pe_buf2[:, :S2, :]
    assert out2.shape == ref2.shape and out2.dtype == ref2.dtype
    assert jnp.allclose(out2, ref2, atol=1e-6, rtol=1e-6)

    # 3) Ragged seq length (S not a multiple of 8) + bf16: exercises the masked
    #    trailing tile (the removed S%8 fallback) and dtype-aware alignment/cast.
    S3, B3, D3 = 100, 100, 64
    pe_buf3 = make_pe_buffer(D3, MAX_LEN)
    x3 = jax.random.normal(key2, (S3, B3, D3), dtype=jnp.float32).astype(jnp.bfloat16)

    out3 = positional_encoding_forward(x3, pe_buf3, block_rows=32, force_pallas=True)
    out3 = jax.block_until_ready(out3)

    ref3 = x3 + pe_buf3[:, :S3, :].astype(jnp.bfloat16)
    assert out3.shape == ref3.shape and out3.dtype == ref3.dtype
    assert jnp.allclose(out3.astype(jnp.float32), ref3.astype(jnp.float32),
                        atol=1e-2, rtol=1e-2)

    print("KERNEL_OK")
</pallas_src>

<mosaic_0001>
module attributes {stable_mosaic.version = 11 : i64} {
  func.func @_pe_add_kernel(%arg0: i32, %arg1: i32, %arg2: memref<8x256xf32, #tpu.memory_space<vmem>>, %arg3: memref<1x256xf32, #tpu.memory_space<vmem>>, %arg4: memref<8x256xf32, #tpu.memory_space<vmem>>) attributes {dimension_semantics = [#tpu.dimension_semantics<parallel>, #tpu.dimension_semantics<arbitrary>], iteration_bounds = array<i64: 1, 1>, scalar_prefetch = 0 : i64, scratch_operands = 0 : i64, tpu.core_type = #tpu.core_type<tc>, window_params = [{transform_indices = @transform_0, window_bounds = array<i64: 8, 256>}, {transform_indices = @transform_1, window_bounds = array<i64: 1, 256>}, {transform_indices = @transform_2, window_bounds = array<i64: 8, 256>}]} {
    %c0 = arith.constant 0 : index
    %c0_0 = arith.constant 0 : index
    %0 = vector.load %arg2[%c0, %c0_0] : memref<8x256xf32, #tpu.memory_space<vmem>>, vector<8x256xf32>
    %c0_1 = arith.constant 0 : index
    %c0_2 = arith.constant 0 : index
    %1 = vector.load %arg3[%c0_1, %c0_2] : memref<1x256xf32, #tpu.memory_space<vmem>>, vector<1x256xf32>
    %2 = vector.broadcast %1 : vector<1x256xf32> to vector<8x256xf32>
    %3 = arith.addf %0, %2 : vector<8x256xf32>
    %c0_3 = arith.constant 0 : index
    %c0_4 = arith.constant 0 : index
    %4 = vector.load %arg4[%c0_3, %c0_4] : memref<8x256xf32, #tpu.memory_space<vmem>>, vector<8x256xf32>
    tpu.vector_store %arg4[%c0_3, %c0_4], %3 {strides = array<i32>} : memref<8x256xf32, #tpu.memory_space<vmem>>, vector<8x256xf32>,
    return
  }
  func.func @transform_0(%arg0: i32, %arg1: i32) -> (i32, i32) {
    %c0_i32 = arith.constant 0 : i32
    return %arg0, %arg1 : i32, i32
  }
  func.func @transform_1(%arg0: i32, %arg1: i32) -> (i32, i32) {
    %c0_i32 = arith.constant 0 : i32
    %c0_i32_0 = arith.constant 0 : i32
    return %c0_i32, %arg1 : i32, i32
  }
  func.func @transform_2(%arg0: i32, %arg1: i32) -> (i32, i32) {
    %c0_i32 = arith.constant 0 : i32
    return %arg0, %arg1 : i32, i32
  }
}

</mosaic_0001>

<bundles_post_ra>
// kernel: tpu_custom_call.1
= control target key start
LH: loop header
LB: loop body
LE: loop exit
PB: predicated region body
PF: predicated region fallthrough
CT: control target
= control target key end

     0   :  { %7 = vsyncpa [#allocation3], 0  ;;  %s178_s0 = inlined_call_operand.hbm [shape: f32[8,256], index: 0, kind: input, shape index: {}]   ;;  %s179_s1 = inlined_call_operand.hbm [shape: f32[1,256], index: 1, kind: input, shape index: {}]   ;;  %s180_s2 = inlined_call_operand.hbm [shape: f32[8,256], index: 2, kind: output, shape index: {}]  }
   0x1   :  { %8 = vsyncpa [#allocation6], 0 }
   0x2   :  { %9 = vsyncpa [#allocation4], 0  ;;  %s15_s11 = sshll.u32 %s178_s0, 4  ;;  %s151_s12 = smov [#allocation2]   ;;  %s16_s11 = int_to_ptr.hbm [resolvable:$true] %s15_s11 }
   0x3   :  { %s17_s13 = sshll.u32 %s151_s12, 4  ;;  %s26_s16 = sshll.u32 %s179_s1, 4  ;;  %s18_s13 = int_to_ptr.vmem [resolvable:$true] %s17_s13  ;;  %s27_s16 = int_to_ptr.hbm [resolvable:$true] %s26_s16 }
   0x4   :  { %20 = dma.hbm_to_vmem [thread:$0]  %s16_s11, 256, %s18_s13, [#allocation3]  }
   0x5   :  { %s152_s17 = smov [#allocation5]  }
   0x6   :  { %s28_s18 = sshll.u32 %s152_s17, 4  ;;  %s29_s18 = int_to_ptr.vmem [resolvable:$true] %s28_s18 }
   0x7   :  { %31 = dma.hbm_to_vmem [thread:$0]  %s27_s16, 32, %s29_s18, [#allocation6]  }
   0x8   :  { %145 = dma.done.wait [#allocation3], 256  }
   0x9   :  { %146 = vsyncadd [#allocation3], 4294967040 }
   0xa   :  { %147 = dma.done.wait [#allocation6], 32  }
   0xb   :  { %148 = vsyncadd [#allocation6], 4294967264  ;;  %v40_v0 = vld [vmem:[#allocation2] sm:$0xff]  ;;  %v42_v1 = vld [vmem:[#allocation5] sm:$0x3]  ;;  %s153_s0 = smov [#allocation7]  }
   0xc   :  { %v41_v2 = vld [vmem:[#allocation2 + $0x8] sm:$0xff]  ;;  %v44_v3 = vperm.slane %v42_v1, 0  ;;  %v45_v4 = vperm.slane %v42_v1, 1  ;;  %s57_s19 = sshll.u32 %s153_s0, 4  ;;  %s59_s1 = sshll.u32 %s180_s2, 4  ;;  %s58_s19 = int_to_ptr.vmem [resolvable:$true] %s57_s19  ;;  %s60_s1 = int_to_ptr.hbm [resolvable:$true] %s59_s1 }
   0xe   :  { %v48_v5 = vadd.f32 %v44_v3, %v40_v0  ;;  %v49_v6 = vadd.f32 %v45_v4, %v41_v2 }
  0x10   :  { %50 = vst [vmem:[#allocation7] sm:$0xff] %v48_v5 }
  0x11   :  { %51 = vst [vmem:[#allocation7 + $0x8] sm:$0xff] %v49_v6 }
  0x12   :  { %62 = dma.vmem_to_hbm [thread:$0]  %s58_s19, 256, %s60_s1, [#allocation4]  }
  0x13   :  { %149 = dma.done.wait [#allocation4], 256  }
  0x14   :  { %150 = vsyncadd [#allocation4], 4294967040 }
  0x15   :  { %67 = vsyncpa [#allocation3], 1 }
  0x16   :  { %68 = vsyncpa [#allocation6], 1 }
  0x17   :  { %69 = vsyncpa [#allocation4], 1 }

</bundles_post_ra>
